<compile_context>
chip_gen: v6e
topology: v6e:2x2x1
jax: 0.10.0
libtpu: 0.0.40
codegen_flags: <defaults>
</compile_context>

<pallas_src>
import functools

import jax
import jax.numpy as jnp
from jax.experimental import pallas as pl
from jax.experimental.pallas import tpu as pltpu

LN_EPS = 1e-5  # nn.LayerNorm default
_MIB = 1024 * 1024


def _round_up(x, m):
    return (x + m - 1) // m * m


def _cdiv(a, b):
    return (a + b - 1) // b


@functools.lru_cache(maxsize=1)
def _vmem_capacity_bytes():
    # Generation-aware physical VMEM (v5e/v6e: 128 MiB, v7x: 64 MiB per TC).
    try:
        return int(pltpu.get_tpu_info().vmem_capacity_bytes)
    except Exception:
        return 64 * _MIB  # conservative (v7x-sized) fallback


def _prenorm_fn_kernel(x_ref, g_ref, b_ref, w_ref, wb_ref, o_ref):
    # LayerNorm statistics in f32 (v5e VPU/EUP have no bf16; matches PyTorch).
    x = x_ref[...].astype(jnp.float32)
    d = x.shape[-1]
    inv_d = jnp.float32(1.0 / d)

    # One fused sweep: E[x], E[x^2] -> biased variance, like nn.LayerNorm.
    # NOTE: E[x^2]-E[x]^2 can cancel when |mean| >> spread; clamped >= 0. Fine for
    # typical ViT activations (inputs are roughly zero-mean per token).
    s1 = jnp.sum(x, axis=-1, keepdims=True)
    s2 = jnp.sum(x * x, axis=-1, keepdims=True)
    mean = s1 * inv_d
    var = jnp.maximum(s2 * inv_d - mean * mean, 0.0)
    xn = (x - mean) * jax.lax.rsqrt(var + LN_EPS)
    y = xn * g_ref[...].astype(jnp.float32) + b_ref[...].astype(jnp.float32)

    # fn: Linear(dim -> hidden). Feed the MXU in W's native dtype (bf16 fast path
    # when the weights are bf16); accumulate in f32.
    w = w_ref[...]
    out = jnp.dot(y.astype(w.dtype), w, preferred_element_type=jnp.float32)
    out = out + wb_ref[...].astype(jnp.float32)
    o_ref[...] = out.astype(o_ref.dtype)


@functools.partial(jax.jit, static_argnames=("tm", "matmul_dtype"))
def prenorm_linear(x, gamma, beta, w, wb, *, tm=512, matmul_dtype=None):
    """PreNorm(dim, Linear(dim, hidden)) forward.

    x:     (B, N, D)
    gamma: (D,)   LayerNorm weight
    beta:  (D,)   LayerNorm bias
    w:     (D, H) Linear weight (input-major)
    wb:    (H,)   Linear bias
    tm:    requested token tile; actual tile is shrunk to fit the VMEM budget.
    matmul_dtype: optionally force the MXU dtype (e.g. jnp.bfloat16 for f32 weights).
    returns (B, N, H), dtype of x.
    """
    B, N, D = x.shape
    H = w.shape[1]
    M = B * N

    if matmul_dtype is not None:
        w = w.astype(matmul_dtype)

    # Pad H to a lane multiple for lane-dense, unmasked output stores. Padded W/wb
    # columns are zero -> padded output columns are exactly zero and sliced off.
    H_pad = _round_up(H, 128)
    w_p = w if H_pad == H else jnp.pad(w, ((0, 0), (0, H_pad - H)))
    wb_p = wb if H_pad == H else jnp.pad(wb, ((0, H_pad - H),))

    out_dtype = x.dtype
    dx = jnp.dtype(x.dtype).itemsize
    dw = jnp.dtype(w_p.dtype).itemsize
    do = jnp.dtype(out_dtype).itemsize

    # ---- generation-aware tile / VMEM selection -----------------------------
    pack = 16 if x.dtype == jnp.bfloat16 else 8  # sublane packing of the token axis

    cap = _vmem_capacity_bytes()
    budget = int(cap * 0.6)  # ~38 MiB on v7x (64 MiB phys), ~77 MiB on v5e/v6e (128)

    def footprint(t):
        return (2 * t * D * dx              # x tile, double-buffered
                + 2 * t * H_pad * do        # out tile, double-buffered
                + D * H_pad * dw            # W, single-buffered (pl.Buffered(1))
                + 2 * D * 4 + H_pad * 4     # gamma / beta / wb
                + 2 * t * D * 4             # in-kernel f32 LN temporaries
                + t * H_pad * 4)            # f32 matmul accumulator

    tm_eff = _round_up(max(tm, pack), pack)
    while footprint(tm_eff) > budget and tm_eff > pack:
        tm_eff = max(pack, _round_up(tm_eff // 2, pack))
    # TODO(synk): if footprint(pack) still exceeds budget (huge f32 weights on v7x),
    # tile the H axis with a second grid dimension instead of shrinking tm further.

    # Clamp to the (sublane-aligned) token count; only the tiny-M case pads (<pack rows).
    tm_eff = min(tm_eff, _round_up(M, pack))
    M_out = M if M >= tm_eff else tm_eff
    grid_m = _cdiv(M_out, tm_eff)

    # v7x megacore: the "parallel" grid axis is sharded across 2 TensorCores; a short
    # odd grid (3/5/7 steps) leaves one core badly under-loaded -> prefer even length.
    if 1 < grid_m < 8 and grid_m % 2 == 1:
        tm_alt = _round_up(_cdiv(M_out, grid_m + 1), pack)
        if pack <= tm_alt < tm_eff:
            tm_eff = tm_alt
            grid_m = _cdiv(M_out, tm_eff)

    vmem_limit = int(max(32 * _MIB,
                         min(budget, int(footprint(tm_eff) * 1.25) + 4 * _MIB)))

    x2 = x.reshape(M, D)
    if M_out != M:  # only when M < one tile: pads at most pack-1 rows (negligible)
        x2 = jnp.pad(x2, ((0, M_out - M), (0, 0)))

    g2 = gamma.reshape(1, D)
    b2 = beta.reshape(1, D)
    wb2 = wb_p.reshape(1, H_pad)

    # gamma/beta/W/wb have constant index_maps -> never re-fetched; single-buffer them
    # so W's VMEM footprint is D*H_pad*dtype instead of 2x.
    invariant = pl.Buffered(1)

    cost = pl.CostEstimate(
        flops=2 * M * D * H_pad + 8 * M * D,
        transcendentals=M,
        bytes_accessed=(M * D * dx + D * H_pad * dw + M * H_pad * do
                        + 2 * D * dx + H_pad * dw),
    )

    out = pl.pallas_call(
        _prenorm_fn_kernel,
        out_shape=jax.ShapeDtypeStruct((M_out, H_pad), out_dtype),
        grid_spec=pltpu.PrefetchScalarGridSpec(
            num_scalar_prefetch=0,
            grid=(grid_m,),
            in_specs=[
                pl.BlockSpec((tm_eff, D), lambda i: (i, 0)),                        # x (streamed)
                pl.BlockSpec((1, D), lambda i: (0, 0), pipeline_mode=invariant),    # gamma
                pl.BlockSpec((1, D), lambda i: (0, 0), pipeline_mode=invariant),    # beta
                pl.BlockSpec((D, H_pad), lambda i: (0, 0), pipeline_mode=invariant),  # W
                pl.BlockSpec((1, H_pad), lambda i: (0, 0), pipeline_mode=invariant),  # W bias
            ],
            out_specs=pl.BlockSpec((tm_eff, H_pad), lambda i: (i, 0)),
        ),
        compiler_params=pltpu.CompilerParams(
            dimension_semantics=("parallel",),
            vmem_limit_bytes=vmem_limit,
        ),
        cost_estimate=cost,
    )(x2, g2, b2, w_p, wb2)

    if M_out != M:
        out = out[:M]
    if H_pad != H:
        out = out[:, :H]
    return out.reshape(B, N, H)


def _reference(x, gamma, beta, w, wb):
    xf = x.astype(jnp.float32)
    mean = jnp.mean(xf, axis=-1, keepdims=True)
    var = jnp.mean((xf - mean) ** 2, axis=-1, keepdims=True)
    y = (xf - mean) / jnp.sqrt(var + LN_EPS) * gamma.astype(jnp.float32) \
        + beta.astype(jnp.float32)
    out = y @ w.astype(jnp.float32) + wb.astype(jnp.float32)
    return out.astype(x.dtype)


if __name__ == "__main__":
    key = jax.random.PRNGKey(0)
    kx, kw, kb = jax.random.split(key, 3)

    # --- f32 correctness check (small ViT-like PreNorm(Linear)) --------------
    B, N, D, H = 2, 8, 32, 64
    x = jax.random.normal(kx, (B, N, D), dtype=jnp.float32)
    gamma = jnp.ones((D,), jnp.float32)                      # nn.LayerNorm weight init
    beta = jnp.zeros((D,), jnp.float32)                      # nn.LayerNorm bias init
    w = jax.random.normal(kw, (D, H), jnp.float32) * 0.02    # fn = Linear(D, H)
    wb = jax.random.normal(kb, (H,), jnp.float32) * 0.02

    out = jax.block_until_ready(prenorm_linear(x, gamma, beta, w, wb))
    ref = _reference(x, gamma, beta, w, wb)
    assert out.shape == (B, N, H)
    assert jnp.allclose(out, ref, atol=1e-4, rtol=1e-4), "f32 mismatch vs reference"

    # --- bf16 fast path (ragged M exercises the cdiv grid / tiny pad) --------
    B2, N2 = 2, 13                                           # M = 26
    x16 = jax.random.normal(kx, (B2, N2, D), dtype=jnp.float32).astype(jnp.bfloat16)
    w16, wb16 = w.astype(jnp.bfloat16), wb.astype(jnp.bfloat16)
    g16, b16 = gamma.astype(jnp.bfloat16), beta.astype(jnp.bfloat16)

    out16 = jax.block_until_ready(prenorm_linear(x16, g16, b16, w16, wb16))
    ref16 = _reference(x16, g16, b16, w16, wb16)
    assert out16.shape == (B2, N2, H)
    assert jnp.allclose(out16.astype(jnp.float32), ref16.astype(jnp.float32),
                        atol=2e-2, rtol=2e-2), "bf16 mismatch vs reference"

    # --- f32 params, bf16 MXU path (largest compute lever when numerics allow)
    out_mix = jax.block_until_ready(
        prenorm_linear(x, gamma, beta, w, wb, matmul_dtype=jnp.bfloat16))
    assert jnp.allclose(out_mix, ref, atol=2e-2, rtol=2e-2), "bf16-MXU mismatch"

    print("KERNEL_OK")
</pallas_src>

<mosaic_0001>
module attributes {stable_mosaic.version = 11 : i64} {
  func.func @_prenorm_fn_kernel(%arg0: i32, %arg1: memref<16x32xf32, #tpu.memory_space<vmem>>, %arg2: memref<1x32xf32, #tpu.memory_space<vmem>>, %arg3: memref<1x32xf32, #tpu.memory_space<vmem>>, %arg4: memref<32x128xf32, #tpu.memory_space<vmem>>, %arg5: memref<1x128xf32, #tpu.memory_space<vmem>>, %arg6: memref<16x128xf32, #tpu.memory_space<vmem>>) attributes {dimension_semantics = [#tpu.dimension_semantics<parallel>], iteration_bounds = array<i64: 1>, scalar_prefetch = 0 : i64, scratch_operands = 0 : i64, tpu.core_type = #tpu.core_type<tc>, window_params = [{transform_indices = @transform_0, window_bounds = array<i64: 16, 32>}, {pipeline_mode = #tpu.pipeline_mode<synchronous>, transform_indices = @transform_1, window_bounds = array<i64: 1, 32>}, {pipeline_mode = #tpu.pipeline_mode<synchronous>, transform_indices = @transform_2, window_bounds = array<i64: 1, 32>}, {pipeline_mode = #tpu.pipeline_mode<synchronous>, transform_indices = @transform_3, window_bounds = array<i64: 32, 128>}, {pipeline_mode = #tpu.pipeline_mode<synchronous>, transform_indices = @transform_4, window_bounds = array<i64: 1, 128>}, {transform_indices = @transform_5, window_bounds = array<i64: 16, 128>}]} {
    %c0 = arith.constant 0 : index
    %c0_0 = arith.constant 0 : index
    %0 = vector.load %arg1[%c0, %c0_0] : memref<16x32xf32, #tpu.memory_space<vmem>>, vector<16x32xf32>
    %cst = arith.constant dense<0.000000e+00> : vector<16xf32>
    %1 = vector.multi_reduction <add>, %0, %cst [1] : vector<16x32xf32> to vector<16xf32>
    %2 = vector.shape_cast %1 : vector<16xf32> to vector<16x1xf32>
    %3 = arith.mulf %0, %0 : vector<16x32xf32>
    %cst_1 = arith.constant dense<0.000000e+00> : vector<16xf32>
    %4 = vector.multi_reduction <add>, %3, %cst_1 [1] : vector<16x32xf32> to vector<16xf32>
    %5 = vector.shape_cast %4 : vector<16xf32> to vector<16x1xf32>
    %cst_2 = arith.constant 3.125000e-02 : f32
    %6 = vector.broadcast %cst_2 : f32 to vector<16x1xf32>
    %7 = arith.mulf %2, %6 : vector<16x1xf32>
    %cst_3 = arith.constant 3.125000e-02 : f32
    %8 = vector.broadcast %cst_3 : f32 to vector<16x1xf32>
    %9 = arith.mulf %5, %8 : vector<16x1xf32>
    %10 = arith.mulf %7, %7 : vector<16x1xf32>
    %11 = arith.subf %9, %10 : vector<16x1xf32>
    %cst_4 = arith.constant 0.000000e+00 : f32
    %12 = vector.broadcast %cst_4 : f32 to vector<16x1xf32>
    %13 = arith.maximumf %11, %12 : vector<16x1xf32>
    %14 = vector.broadcast %7 : vector<16x1xf32> to vector<16x32xf32>
    %15 = arith.subf %0, %14 : vector<16x32xf32>
    %cst_5 = arith.constant 9.99999974E-6 : f32
    %16 = vector.broadcast %cst_5 : f32 to vector<16x1xf32>
    %17 = arith.addf %13, %16 : vector<16x1xf32>
    %18 = math.rsqrt %17 : vector<16x1xf32>
    %19 = vector.broadcast %18 : vector<16x1xf32> to vector<16x32xf32>
    %20 = arith.mulf %15, %19 : vector<16x32xf32>
    %c0_6 = arith.constant 0 : index
    %c0_7 = arith.constant 0 : index
    %21 = vector.load %arg2[%c0_6, %c0_7] : memref<1x32xf32, #tpu.memory_space<vmem>>, vector<1x32xf32>
    %22 = vector.broadcast %21 : vector<1x32xf32> to vector<16x32xf32>
    %23 = arith.mulf %20, %22 : vector<16x32xf32>
    %c0_8 = arith.constant 0 : index
    %c0_9 = arith.constant 0 : index
    %24 = vector.load %arg3[%c0_8, %c0_9] : memref<1x32xf32, #tpu.memory_space<vmem>>, vector<1x32xf32>
    %25 = vector.broadcast %24 : vector<1x32xf32> to vector<16x32xf32>
    %26 = arith.addf %23, %25 : vector<16x32xf32>
    %c0_10 = arith.constant 0 : index
    %c0_11 = arith.constant 0 : index
    %27 = vector.load %arg4[%c0_10, %c0_11] : memref<32x128xf32, #tpu.memory_space<vmem>>, vector<32x128xf32>
    %cst_12 = arith.constant dense<0.000000e+00> : vector<16x128xf32>
    %28 = tpu.matmul %26, %27, %cst_12 {dimension_numbers = #tpu.dot_dimension_numbers<[1], [0], [0], [1], [0, 0, 1, 1], [], []>} : vector<16x32xf32>, vector<32x128xf32>, vector<16x128xf32> -> vector<16x128xf32>
    %c0_13 = arith.constant 0 : index
    %c0_14 = arith.constant 0 : index
    %29 = vector.load %arg5[%c0_13, %c0_14] : memref<1x128xf32, #tpu.memory_space<vmem>>, vector<1x128xf32>
    %30 = vector.broadcast %29 : vector<1x128xf32> to vector<16x128xf32>
    %31 = arith.addf %28, %30 : vector<16x128xf32>
    %c0_15 = arith.constant 0 : index
    %c0_16 = arith.constant 0 : index
    %32 = vector.load %arg6[%c0_15, %c0_16] : memref<16x128xf32, #tpu.memory_space<vmem>>, vector<16x128xf32>
    tpu.vector_store %arg6[%c0_15, %c0_16], %31 {strides = array<i32>} : memref<16x128xf32, #tpu.memory_space<vmem>>, vector<16x128xf32>,
    return
  }
  func.func @transform_0(%arg0: i32) -> (i32, i32) {
    %c0_i32 = arith.constant 0 : i32
    %c0_i32_0 = arith.constant 0 : i32
    return %arg0, %c0_i32 : i32, i32
  }
  func.func @transform_1(%arg0: i32) -> (i32, i32) {
    %c0_i32 = arith.constant 0 : i32
    %c0_i32_0 = arith.constant 0 : i32
    %c0_i32_1 = arith.constant 0 : i32
    return %c0_i32, %c0_i32_0 : i32, i32
  }
  func.func @transform_2(%arg0: i32) -> (i32, i32) {
    %c0_i32 = arith.constant 0 : i32
    %c0_i32_0 = arith.constant 0 : i32
    %c0_i32_1 = arith.constant 0 : i32
    return %c0_i32, %c0_i32_0 : i32, i32
  }
  func.func @transform_3(%arg0: i32) -> (i32, i32) {
    %c0_i32 = arith.constant 0 : i32
    %c0_i32_0 = arith.constant 0 : i32
    %c0_i32_1 = arith.constant 0 : i32
    return %c0_i32, %c0_i32_0 : i32, i32
  }
  func.func @transform_4(%arg0: i32) -> (i32, i32) {
    %c0_i32 = arith.constant 0 : i32
    %c0_i32_0 = arith.constant 0 : i32
    %c0_i32_1 = arith.constant 0 : i32
    return %c0_i32, %c0_i32_0 : i32, i32
  }
  func.func @transform_5(%arg0: i32) -> (i32, i32) {
    %c0_i32 = arith.constant 0 : i32
    %c0_i32_0 = arith.constant 0 : i32
    return %arg0, %c0_i32 : i32, i32
  }
}

</mosaic_0001>

<bundles_post_ra>
// kernel: prenorm_linear.1
= control target key start
LH: loop header
LB: loop body
LE: loop exit
PB: predicated region body
PF: predicated region fallthrough
CT: control target
= control target key end

     0   :  { %vm22_vm0 = vcmask 261120   ;;  %s266_s0 = inlined_call_operand.vmem [shape: f32[16,32], index: 0, kind: input, shape index: {}]   ;;  %s267_s3 = inlined_call_operand.vmem [shape: f32[32,128], index: 3, kind: input, shape index: {}]   ;;  %s268_s1 = inlined_call_operand.vmem [shape: f32[1,32], index: 1, kind: input, shape index: {}]   ;;  %s269_s2 = inlined_call_operand.vmem [shape: f32[1,32], index: 2, kind: input, shape index: {}]   ;;  %s270_s4 = inlined_call_operand.vmem [shape: f32[1,128], index: 4, kind: input, shape index: {}]   ;;  %s271_s5 = inlined_call_operand.vmem [shape: f32[16,128], index: 5, kind: output, shape index: {}]  }
   0x1   :  { %v20_v0 = vld [vmem:[%s266_s0] sm:$0xff]  ;;  %v21_v1 = vld [vmem:[%s266_s0 + $0x8] sm:$0xff]  ;;  %v76_v8 = vld [vmem:[%s267_s3 + $0x18] sm:$0xff] }
   0x2   :  { %v23_v2 = vsel %vm22_vm0, %v20_v0, 0.0  ;;  %v29_v3 = vmul.f32 %v20_v0, %v20_v0  ;;  %v30_v4 = vmul.f32 %v21_v1, %v21_v1  ;;  %v26_v6 = vsel %vm22_vm0, %v21_v1, 0.0  ;;  %v75_v9 = vld [vmem:[%s267_s3 + $0x10] sm:$0xff]  ;;  %182 = vmatprep.subr.mxu0 %v76_v8  ;;  %v74_v10 = vld [vmem:[%s267_s3 + $0x8] sm:$0xff]  ;;  %v73_v11 = vld [vmem:[%s267_s3] sm:$0xff] }
   0x3   :  { %24 = vadd.xlane.f32.xlu0 %v23_v2  ;;  %183 = vmatpush3.msra.mxu0 %v76_v8  ;;  %v171_v30 = vld [vmem:[%s268_s1] ss:$0 sm:$0xff] }
   0x4   :  { %v31_v5 = vsel %vm22_vm0, %v29_v3, 0.0  ;;  %v34_v7 = vsel %vm22_vm0, %v30_v4, 0.0  ;;  %184 = vmatprep.subr.mxu0 %v75_v9  ;;  %v172_v32 = vld [vmem:[%s269_s2] ss:$0 sm:$0xff] }
   0x5   :  { %32 = vadd.xlane.f32.xlu1 %v31_v5  ;;  %185 = vmatpush3.msra.mxu0 %v75_v9  ;;  %v173_v40 = vld [vmem:[%s270_s4] ss:$0 sm:$0xff] }
   0x6   :  { %186 = vmatprep.subr.mxu0 %v74_v10 }
   0x7   :  { %27 = vadd.xlane.f32.xlu0 %v26_v6  ;;  %187 = vmatpush3.msra.mxu0 %v74_v10 }
   0x8   :  { %188 = vmatprep.subr.mxu0 %v73_v11 }
   0x9   :  { %35 = vadd.xlane.f32.xlu1 %v34_v7  ;;  %189 = vmatpush3.msra.mxu0 %v73_v11 }
  0x8c   :  { %v25_v12 = vpop.xlane.xlu0 %24 }
  0x8d   :  { %v37_v13 = vmul.f32 0.03125, %v25_v12 }
  0x8e   :  { %v33_v14 = vpop.xlane.xlu1 %32 }
  0x8f   :  { %v41_v15 = vmul.f32 %v37_v13, %v37_v13  ;;  %v39_v16 = vmul.f32 0.03125, %v33_v14  ;;  %v47_v28 = vsub.f32 %v20_v0, %v37_v13 }
  0x90   :  { %v28_v17 = vpop.xlane.xlu0 %27 }
  0x91   :  { %v43_v18 = vsub.f32 %v39_v16, %v41_v15  ;;  %v38_v19 = vmul.f32 0.03125, %v28_v17 }
  0x92   :  { %v36_v20 = vpop.xlane.xlu1 %35 }
  0x93   :  { %v45_v21 = vmax.f32 %v43_v18, 0.0  ;;  %v42_v22 = vmul.f32 %v38_v19, %v38_v19  ;;  %v40_v23 = vmul.f32 0.03125, %v36_v20  ;;  %v48_v33 = vsub.f32 %v21_v1, %v38_v19 }
  0x95   :  { %v49_v24 = vadd.f32 1e-05, %v45_v21  ;;  %v44_v25 = vsub.f32 %v40_v23, %v42_v22 }
  0x97   :  { %193 = vrsqrt.f32 %v49_v24  ;;  %v46_v26 = vmax.f32 %v44_v25, 0.0 }
  0x99   :  { %v50_v27 = vadd.f32 1e-05, %v46_v26 }
  0x9b   :  { %195 = vrsqrt.f32 %v50_v27 }
  0xa4   :  { %v194_v29 = vpop.eup %193 }
  0xa5   :  { %v53_v31 = vmul.f32 %v194_v29, %v47_v28 }
  0xa7   :  { %v62_v34 = vmul.f32 %v171_v30, %v53_v31 }
  0xa8   :  { %v196_v35 = vpop.eup %195 }
  0xa9   :  { %v54_v36 = vmul.f32 %v196_v35, %v48_v33  ;;  %v71_v37 = vadd.f32 %v172_v32, %v62_v34 }
  0xab   :  { %v63_v38 = vmul.f32 %v171_v30, %v54_v36  ;;  %190 = vmatprep.mubr.msk.f32.mxu0 %vm22_vm0, %v71_v37 }
  0xad   :  { %v72_v39 = vadd.f32 %v172_v32, %v63_v38 }
  0xaf   :  { %191 = vmatmul.mubr.msk.f32.vlgmr.msra.gmra.mxu0 %vm22_vm0, %v72_v39 }
 0x16f   :  { %v192_v41 = vpop.f32.mrf.mxu0 }
 0x170   :  { %v162_v42 = vadd.f32 %v192_v41, %v173_v40 }
 0x171   :  { %v156_v43 = vpop.f32.mrf.mxu0 }
 0x172   :  { %166 = vst [vmem:[%s271_s5 + $0x8] sm:$0xff] %v162_v42  ;;  %v157_v44 = vadd.f32 %v173_v40, %v156_v43 }
 0x174   :  { %165 = vst [vmem:[%s271_s5] sm:$0xff] %v157_v44 }

</bundles_post_ra>
